<compile_context>
chip_gen: v7x
topology: tpu7x:2x2x1
jax: 0.10.0
libtpu: 0.0.40
codegen_flags: <defaults>
</compile_context>

<pallas_src>
import functools

import jax
import jax.numpy as jnp
from jax import lax
from jax.experimental import pallas as pl
from jax.experimental.pallas import tpu as pltpu

EPS = 1e-5
LANE = 128
SUBLANE = 16            # bf16 sublane packing -> row tiles multiples of 16
STATS_ROWS = 8          # per-tile stats block: row0=sum, row1=sum-of-squares


def _round_up(x, m):
    return (x + m - 1) // m * m


# ---------------------------------------------------------------------------
# Generation-dependent VMEM limit and single-buffering capability probe
# ---------------------------------------------------------------------------
def _vmem_limit_bytes():
    cap = None
    try:
        cap = int(pltpu.get_tpu_info().vmem_capacity_bytes)
    except Exception:
        cap = None
    if cap is None:
        return 48 * 1024 * 1024           # conservative: fits v7x's 64 MiB
    if cap >= 100 * 1024 * 1024:
        return 96 * 1024 * 1024           # v5e / v6e (128 MiB parts)
    return 48 * 1024 * 1024               # v7x


def _probe_copy_kernel(x_ref, o_ref):
    o_ref[...] = x_ref[...]


@functools.lru_cache(maxsize=None)
def _single_buffer_ok():
    """True iff pipeline_mode=pl.Buffered(1) builds + runs on this install."""
    if not hasattr(pl, "Buffered"):
        return False
    try:
        spec = pl.BlockSpec((8, 128), lambda i: (0, 0),
                            pipeline_mode=pl.Buffered(1))
        fn = pl.pallas_call(
            _probe_copy_kernel,
            out_shape=jax.ShapeDtypeStruct((8, 128), jnp.float32),
            grid=(1,),
            in_specs=[spec],
            out_specs=pl.BlockSpec((8, 128), lambda i: (0, 0)),
        )
        jax.block_until_ready(fn(jnp.zeros((8, 128), jnp.float32)))
        return True
    except Exception:
        return False


def _spec(block_shape, index_map, buffers=None):
    """BlockSpec; optionally single/multi-buffered when supported."""
    if buffers is not None and _single_buffer_ok():
        try:
            return pl.BlockSpec(block_shape, index_map,
                                pipeline_mode=pl.Buffered(buffers))
        except TypeError:
            pass
    return pl.BlockSpec(block_shape, index_map)


# ---------------------------------------------------------------------------
# Kernel 1: style-side projections  G = g(mvn(style_key)), H = h(mvn(style))
#   inputs are pre-normalized bf16; grid = (batch, ns_blocks)
# ---------------------------------------------------------------------------
def _style_proj_kernel(skey_ref, style_ref, wgT_ref, bg_ref, whT_ref, bh_ref,
                       g_ref, h_ref):
    g = jnp.dot(skey_ref[0], wgT_ref[...],
                preferred_element_type=jnp.float32) + bg_ref[...]
    g_ref[0] = g.astype(jnp.bfloat16)
    hmat = jnp.dot(style_ref[0], whT_ref[...],
                   preferred_element_type=jnp.float32) + bh_ref[...]
    h_ref[0] = hmat.astype(jnp.bfloat16)


# ---------------------------------------------------------------------------
# Kernel 2: tiled attention with online softmax; emits per-tile partial
#   mean_feat statistics only (AdaIN never needs the full mean_feat tensor).
#   grid = (batch, nc_tiles, ns_blocks) -> (parallel, parallel, arbitrary)
# ---------------------------------------------------------------------------
def _attention_kernel(ck_ref, g_ref, h_ref, wfT_ref, bf_ref, wc0T_ref, bc0_ref,
                      stats_ref, f_scr, m_scr, l_scr, acc_scr,
                      *, ns_real, ns_pad, block_ns, nc_real, nc_pad, tile_nc,
                      gh_resident):
    qi = pl.program_id(1)
    si = pl.program_id(2)
    last = pl.num_programs(2) - 1

    @pl.when(si == 0)
    def _init():
        # F = f(mvn(content_key)) for this query tile, cached across si.
        f = jnp.dot(ck_ref[0], wfT_ref[...],
                    preferred_element_type=jnp.float32) + bf_ref[...]
        f_scr[...] = f.astype(jnp.bfloat16)
        m_scr[...] = jnp.full_like(m_scr, -jnp.inf)
        l_scr[...] = jnp.zeros_like(l_scr)
        acc_scr[...] = jnp.zeros_like(acc_scr)

    if gh_resident:
        # G/H live fully in VMEM per batch element; slice this style block.
        start = pl.multiple_of(si * block_ns, block_ns)
        g_blk = g_ref[0, pl.ds(start, block_ns), :]
        h_blk = h_ref[0, pl.ds(start, block_ns), :]
    else:
        g_blk = g_ref[0]
        h_blk = h_ref[0]

    # Scores (tile_nc, block_ns) = F @ G^T (contract key dims, no transpose).
    s = lax.dot_general(f_scr[...], g_blk,
                        dimension_numbers=(((1,), (1,)), ((), ())),
                        preferred_element_type=jnp.float32)
    if ns_pad != ns_real:
        pos = si * block_ns + lax.broadcasted_iota(jnp.int32, s.shape, 1)
        s = jnp.where(pos < ns_real, s, -jnp.inf)

    # Online-softmax update.
    m_prev = m_scr[...]
    m_new = jnp.maximum(m_prev, jnp.max(s, axis=-1, keepdims=True))
    alpha = jnp.exp(m_prev - m_new)
    p = jnp.exp(s - m_new)
    l_scr[...] = alpha * l_scr[...] + jnp.sum(p, axis=-1, keepdims=True)
    acc_scr[...] = alpha * acc_scr[...] + jnp.dot(
        p.astype(jnp.bfloat16), h_blk, preferred_element_type=jnp.float32)
    m_scr[...] = m_new

    @pl.when(si == last)
    def _finalize():
        attn_mean = acc_scr[...] * pl.reciprocal(l_scr[...], approx=True)
        mean_feat = jnp.dot(attn_mean.astype(jnp.bfloat16), wc0T_ref[...],
                            preferred_element_type=jnp.float32) + bc0_ref[...]
        if nc_pad != nc_real:
            row = qi * tile_nc + lax.broadcasted_iota(
                jnp.int32, mean_feat.shape, 0)
            mean_feat = jnp.where(row < nc_real, mean_feat, 0.0)
        row_sum = jnp.sum(mean_feat, axis=0, keepdims=True)
        row_sq = jnp.sum(mean_feat * mean_feat, axis=0, keepdims=True)
        zeros = jnp.zeros((STATS_ROWS - 2, row_sum.shape[1]), jnp.float32)
        stats_ref[0] = jnp.concatenate([row_sum, row_sq, zeros], axis=0)


# ---------------------------------------------------------------------------
# Kernel 3: elementwise AdaIN with precomputed per-batch channel stats
# ---------------------------------------------------------------------------
def _adain_kernel(c_ref, cmu_ref, cistd_ref, mmu_ref, mstd_ref, out_ref):
    out_ref[0] = (mstd_ref[0] * (c_ref[0] - cmu_ref[0]) * cistd_ref[0]
                  + mmu_ref[0])


# ---------------------------------------------------------------------------
# Wrapper helpers
# ---------------------------------------------------------------------------
def _flatten_nchw(x):
    b, c, hh, ww = x.shape
    return x.transpose(0, 2, 3, 1).reshape(b, hh * ww, c)


def _pad_last2(x, n_to, c_to):
    b, n, c = x.shape
    return jnp.pad(x, ((0, 0), (0, n_to - n), (0, c_to - c)))


def _mvn_to_bf16(x_flat):
    """Per-batch per-channel mean-variance norm (ddof=1), cast to bf16."""
    n = x_flat.shape[1]
    denom = max(n - 1, 1)
    mu = jnp.mean(x_flat, axis=1, keepdims=True)
    var = jnp.sum((x_flat - mu) ** 2, axis=1, keepdims=True) / denom
    return ((x_flat - mu) / jnp.sqrt(var + EPS)).astype(jnp.bfloat16)


def _channel_stats(x_flat, c_to):
    """Per-batch per-channel mean and 1/std (ddof=1), channel-padded to c_to."""
    n = x_flat.shape[1]
    denom = max(n - 1, 1)
    mu = jnp.mean(x_flat, axis=1, keepdims=True)
    var = jnp.sum((x_flat - mu) ** 2, axis=1, keepdims=True) / denom
    istd = 1.0 / jnp.sqrt(var + EPS)
    pad = ((0, 0), (0, 0), (0, c_to - x_flat.shape[2]))
    return jnp.pad(mu, pad), jnp.pad(istd, pad)


def _pad_weight_T(w, cin_to, cout_to):
    """(Cout, Cin) conv weight -> padded, transposed (Cin_p, Cout_p), bf16."""
    cout, cin = w.shape
    wt = jnp.pad(w.T, ((0, cin_to - cin), (0, cout_to - cout)))
    return wt.astype(jnp.bfloat16)


def _pad_bias(bvec, c_to):
    return jnp.pad(bvec, ((0, 0), (0, c_to - bvec.shape[1])))


# ---------------------------------------------------------------------------
# Wrapper
# ---------------------------------------------------------------------------
def adaattn_forward(content, style, content_key, style_key, params,
                    tile_nc=512, block_ns=512, tile_adain=1024):
    """Inputs are NCHW (like the PyTorch module); returns NCHW output."""
    b, C, h, w = content.shape
    Ck = content_key.shape[1]
    nc = h * w
    ns = style_key.shape[2] * style_key.shape[3]

    vmem_limit = _vmem_limit_bytes()

    # ---- lane-dense channel padding + tile sizes ---------------------------
    Cp = _round_up(C, LANE)
    Ckp = _round_up(Ck, LANE)
    tile_nc = min(tile_nc, _round_up(nc, SUBLANE))
    block_ns = min(block_ns, _round_up(ns, SUBLANE))
    tile_adain = min(tile_adain, _round_up(nc, SUBLANE))
    assert tile_nc % SUBLANE == 0 and block_ns % SUBLANE == 0
    assert tile_adain % SUBLANE == 0
    nc_pad = _round_up(nc, tile_nc)
    ns_pad = _round_up(ns, block_ns)
    nc_pad_adain = _round_up(nc, tile_adain)
    n_nc_tiles = nc_pad // tile_nc
    n_ns_blocks = ns_pad // block_ns
    n_adain_tiles = nc_pad_adain // tile_adain

    # G/H VMEM residency decision (worst case: double-buffered, bf16).
    gh_resident = ns_pad * (Ckp + Cp) * 2 * 2 <= vmem_limit // 2

    # ---- NCHW -> (b, N, C); mvn + bf16 fused into the layout/pad pass ------
    c_flat = _flatten_nchw(content)                 # raw f32, AdaIN target
    sk_n = _mvn_to_bf16(_flatten_nchw(style_key))
    s_n = _mvn_to_bf16(_flatten_nchw(style))
    ck_n = _mvn_to_bf16(_flatten_nchw(content_key))

    c_mu, c_istd = _channel_stats(c_flat, Cp)

    c_p = _pad_last2(c_flat, nc_pad_adain, Cp)
    sk_p = _pad_last2(sk_n, ns_pad, Ckp)
    s_p = _pad_last2(s_n, ns_pad, Cp)
    ck_p = _pad_last2(ck_n, nc_pad, Ckp)

    wf, bf, wg, bg, wh, bh, wc0, bc0 = params
    wfT = _pad_weight_T(wf, Ckp, Ckp)
    wgT = _pad_weight_T(wg, Ckp, Ckp)
    whT = _pad_weight_T(wh, Cp, Cp)
    wc0T = _pad_weight_T(wc0, Cp, Cp)
    bf_p = _pad_bias(bf, Ckp)
    bg_p = _pad_bias(bg, Ckp)
    bh_p = _pad_bias(bh, Cp)
    bc0_p = _pad_bias(bc0, Cp)

    # ---- kernel 1: style projections (once per batch element) --------------
    g_mat, h_mat = pl.pallas_call(
        _style_proj_kernel,
        out_shape=(jax.ShapeDtypeStruct((b, ns_pad, Ckp), jnp.bfloat16),
                   jax.ShapeDtypeStruct((b, ns_pad, Cp), jnp.bfloat16)),
        grid_spec=pltpu.PrefetchScalarGridSpec(
            num_scalar_prefetch=0,
            grid=(b, n_ns_blocks),
            in_specs=[
                pl.BlockSpec((1, block_ns, Ckp), lambda bi, si: (bi, si, 0)),
                pl.BlockSpec((1, block_ns, Cp), lambda bi, si: (bi, si, 0)),
                _spec((Ckp, Ckp), lambda bi, si: (0, 0), buffers=1),
                _spec((1, Ckp), lambda bi, si: (0, 0), buffers=1),
                _spec((Cp, Cp), lambda bi, si: (0, 0), buffers=1),
                _spec((1, Cp), lambda bi, si: (0, 0), buffers=1),
            ],
            out_specs=(
                pl.BlockSpec((1, block_ns, Ckp), lambda bi, si: (bi, si, 0)),
                pl.BlockSpec((1, block_ns, Cp), lambda bi, si: (bi, si, 0)),
            ),
        ),
        compiler_params=pltpu.CompilerParams(
            dimension_semantics=("parallel", "parallel"),
            vmem_limit_bytes=vmem_limit),
    )(sk_p, s_p, wgT, bg_p, whT, bh_p)

    # ---- kernel 2: tiled attention (online softmax), partial stats out -----
    if gh_resident:
        g_spec = _spec((1, ns_pad, Ckp), lambda bi, qi, si: (bi, 0, 0),
                       buffers=1)
        h_spec = _spec((1, ns_pad, Cp), lambda bi, qi, si: (bi, 0, 0),
                       buffers=1)
    else:
        g_spec = pl.BlockSpec((1, block_ns, Ckp), lambda bi, qi, si: (bi, si, 0))
        h_spec = pl.BlockSpec((1, block_ns, Cp), lambda bi, qi, si: (bi, si, 0))

    attn_kernel = functools.partial(
        _attention_kernel, ns_real=ns, ns_pad=ns_pad, block_ns=block_ns,
        nc_real=nc, nc_pad=nc_pad, tile_nc=tile_nc, gh_resident=gh_resident)

    stats = pl.pallas_call(
        attn_kernel,
        out_shape=jax.ShapeDtypeStruct((b, n_nc_tiles * STATS_ROWS, Cp),
                                       jnp.float32),
        grid_spec=pltpu.PrefetchScalarGridSpec(
            num_scalar_prefetch=0,
            grid=(b, n_nc_tiles, n_ns_blocks),
            in_specs=[
                pl.BlockSpec((1, tile_nc, Ckp), lambda bi, qi, si: (bi, qi, 0)),
                g_spec,
                h_spec,
                _spec((Ckp, Ckp), lambda bi, qi, si: (0, 0), buffers=1),
                _spec((1, Ckp), lambda bi, qi, si: (0, 0), buffers=1),
                _spec((Cp, Cp), lambda bi, qi, si: (0, 0), buffers=1),
                _spec((1, Cp), lambda bi, qi, si: (0, 0), buffers=1),
            ],
            out_specs=pl.BlockSpec((1, STATS_ROWS, Cp),
                                   lambda bi, qi, si: (bi, qi, 0)),
            scratch_shapes=[
                pltpu.VMEM((tile_nc, Ckp), jnp.bfloat16),   # F tile cache
                pltpu.VMEM((tile_nc, 1), jnp.float32),      # running max
                pltpu.VMEM((tile_nc, 1), jnp.float32),      # running sum
                pltpu.VMEM((tile_nc, Cp), jnp.float32),     # PV accumulator
            ],
        ),
        compiler_params=pltpu.CompilerParams(
            dimension_semantics=("parallel", "parallel", "arbitrary"),
            vmem_limit_bytes=vmem_limit),
    )(ck_p, g_mat, h_mat, wfT, bf_p, wc0T, bc0_p)

    # ---- AdaIN stats from the per-tile partial sums (no mean_feat re-read) -
    stats = stats.reshape(b, n_nc_tiles, STATS_ROWS, Cp)
    m_sum = jnp.sum(stats[:, :, 0, :C], axis=1)              # (b, C)
    m_sq = jnp.sum(stats[:, :, 1, :C], axis=1)               # (b, C)
    m_mu = m_sum / nc
    denom = max(nc - 1, 1)
    m_var = jnp.maximum(m_sq - nc * m_mu * m_mu, 0.0) / denom
    m_std = jnp.sqrt(m_var + EPS)
    cpad = ((0, 0), (0, 0), (0, Cp - C))
    m_mu_p = jnp.pad(m_mu[:, None, :], cpad)
    m_std_p = jnp.pad(m_std[:, None, :], cpad)

    # ---- kernel 3: elementwise AdaIN (large, decoupled row tile) -----------
    out = pl.pallas_call(
        _adain_kernel,
        out_shape=jax.ShapeDtypeStruct((b, nc_pad_adain, Cp), jnp.float32),
        grid_spec=pltpu.PrefetchScalarGridSpec(
            num_scalar_prefetch=0,
            grid=(b, n_adain_tiles),
            in_specs=[
                pl.BlockSpec((1, tile_adain, Cp), lambda bi, qi: (bi, qi, 0)),
                _spec((1, 1, Cp), lambda bi, qi: (bi, 0, 0), buffers=1),
                _spec((1, 1, Cp), lambda bi, qi: (bi, 0, 0), buffers=1),
                _spec((1, 1, Cp), lambda bi, qi: (bi, 0, 0), buffers=1),
                _spec((1, 1, Cp), lambda bi, qi: (bi, 0, 0), buffers=1),
            ],
            out_specs=pl.BlockSpec((1, tile_adain, Cp),
                                   lambda bi, qi: (bi, qi, 0)),
        ),
        compiler_params=pltpu.CompilerParams(
            dimension_semantics=("parallel", "parallel"),
            vmem_limit_bytes=vmem_limit),
    )(c_p, c_mu, c_istd, m_mu_p, m_std_p)

    # (b, Nc_pad, Cp) -> slice real extent -> NCHW
    return out[:, :nc, :C].reshape(b, h, w, C).transpose(0, 3, 1, 2)


# ---------------------------------------------------------------------------
# Deterministic parameter init (PyTorch Conv2d default-style uniform init)
# ---------------------------------------------------------------------------
def init_params(key, in_planes, key_planes):
    ks = jax.random.split(key, 8)

    def conv_init(kw, kb, cout, cin):
        bound = 1.0 / jnp.sqrt(float(cin))
        wmat = jax.random.uniform(kw, (cout, cin), jnp.float32, -bound, bound)
        bvec = jax.random.uniform(kb, (1, cout), jnp.float32, -bound, bound)
        return wmat, bvec

    wf, bf = conv_init(ks[0], ks[1], key_planes, key_planes)
    wg, bg = conv_init(ks[2], ks[3], key_planes, key_planes)
    wh, bh = conv_init(ks[4], ks[5], in_planes, in_planes)
    wc0, bc0 = conv_init(ks[6], ks[7], in_planes, in_planes)
    return (wf, bf, wg, bg, wh, bh, wc0, bc0)


# ---------------------------------------------------------------------------
# Pure-JAX f32 reference (mirrors the PyTorch AdaAttN.forward)
# ---------------------------------------------------------------------------
def reference(content, style, content_key, style_key, params):
    def mean_std_nchw(x):
        b, c = x.shape[:2]
        flat = x.reshape(b, c, -1)
        mu = flat.mean(axis=2).reshape(b, c, 1, 1)
        std = jnp.sqrt(flat.var(axis=2, ddof=1) + EPS).reshape(b, c, 1, 1)
        return mu, std

    def mvn_nchw(x):
        mu, std = mean_std_nchw(x)
        return (x - mu) / std

    def conv1x1(x, wmat, bvec):
        return jnp.einsum('bchw,oc->bohw', x, wmat) + bvec.reshape(1, -1, 1, 1)

    wf, bf, wg, bg, wh, bh, wc0, bc0 = params
    F = conv1x1(mvn_nchw(content_key), wf, bf)
    G = conv1x1(mvn_nchw(style_key), wg, bg)
    H = conv1x1(mvn_nchw(style), wh, bh)
    b_, Ck, h, w = F.shape
    ns = G.shape[2] * G.shape[3]
    Gf = G.reshape(b_, Ck, ns)
    style_flat = H.reshape(b_, H.shape[1], ns).transpose(0, 2, 1)
    Ff = F.reshape(b_, Ck, h * w).transpose(0, 2, 1)
    S = jax.nn.softmax(jnp.einsum('bnc,bcm->bnm', Ff, Gf), axis=-1)
    mean = jnp.einsum('bnm,bmc->bnc', S, style_flat)
    mean = mean.reshape(b_, h, w, -1).transpose(0, 3, 1, 2)
    mean = conv1x1(mean, wc0, bc0)
    cm, cs = mean_std_nchw(content)
    sm, ss = mean_std_nchw(mean)
    return ss * (content - cm) / cs + sm


# ---------------------------------------------------------------------------
if __name__ == "__main__":
    key = jax.random.PRNGKey(0)
    k_c, k_s, k_ck, k_sk, k_p = jax.random.split(key, 5)

    b, in_planes, key_planes = 2, 4, 8
    h, w = 16, 16          # content spatial  -> Nc = 256
    hs, ws = 8, 8          # style spatial    -> Ns = 64

    content = jax.random.normal(k_c, (b, in_planes, h, w), jnp.float32)
    style = jax.random.normal(k_s, (b, in_planes, hs, ws), jnp.float32)
    content_key = jax.random.normal(k_ck, (b, key_planes, h, w), jnp.float32)
    style_key = jax.random.normal(k_sk, (b, key_planes, hs, ws), jnp.float32)

    params = init_params(k_p, in_planes, key_planes)

    # Small, non-dividing tiles so the multi-tile / online-softmax / padded
    # row+column masking paths are all exercised:
    #   3 query tiles of 96 rows (32 padded rows in the last one),
    #   2 style blocks of 48 positions (32 padded positions in the last one),
    #   3 AdaIN tiles of 112 rows.
    out = adaattn_forward(content, style, content_key, style_key, params,
                          tile_nc=96, block_ns=48, tile_adain=112)
    out = jax.block_until_ready(out)

    ref = reference(content, style, content_key, style_key, params)
    assert out.shape == content.shape and out.dtype == jnp.float32

    # bf16 MXU inputs + approx reciprocal vs a pure-f32 reference: allow a
    # loose absolute bound but require a tight mean error (gross bugs blow
    # past both by orders of magnitude).
    max_err = float(jnp.max(jnp.abs(out - ref)))
    mean_err = float(jnp.mean(jnp.abs(out - ref)))
    if not (max_err < 1e-1 and mean_err < 2e-2):
        raise AssertionError(
            f"Pallas AdaAttN mismatch vs reference: "
            f"max_err={max_err:.4f}, mean_err={mean_err:.4f}")

    print("KERNEL_OK")
</pallas_src>

<mosaic_0001>
module attributes {stable_mosaic.version = 11 : i64} {
  func.func @_probe_copy_kernel(%arg0: i32, %arg1: memref<8x128xf32, #tpu.memory_space<vmem>>, %arg2: memref<8x128xf32, #tpu.memory_space<vmem>>) attributes {dimension_semantics = [#tpu.dimension_semantics<arbitrary>], iteration_bounds = array<i64: 1>, scalar_prefetch = 0 : i64, scratch_operands = 0 : i64, tpu.core_type = #tpu.core_type<tc>, window_params = [{pipeline_mode = #tpu.pipeline_mode<synchronous>, transform_indices = @transform_0, window_bounds = array<i64: 8, 128>}, {pipeline_mode = #tpu.pipeline_mode<synchronous>, transform_indices = @transform_1, window_bounds = array<i64: 8, 128>}]} {
    %c0 = arith.constant 0 : index
    %c0_0 = arith.constant 0 : index
    %0 = vector.load %arg1[%c0, %c0_0] : memref<8x128xf32, #tpu.memory_space<vmem>>, vector<8x128xf32>
    %c0_1 = arith.constant 0 : index
    %c0_2 = arith.constant 0 : index
    %1 = vector.load %arg2[%c0_1, %c0_2] : memref<8x128xf32, #tpu.memory_space<vmem>>, vector<8x128xf32>
    tpu.vector_store %arg2[%c0_1, %c0_2], %0 {strides = array<i32>} : memref<8x128xf32, #tpu.memory_space<vmem>>, vector<8x128xf32>,
    return
  }
  func.func @transform_0(%arg0: i32) -> (i32, i32) {
    %c0_i32 = arith.constant 0 : i32
    %c0_i32_0 = arith.constant 0 : i32
    %c0_i32_1 = arith.constant 0 : i32
    return %c0_i32, %c0_i32_0 : i32, i32
  }
  func.func @transform_1(%arg0: i32) -> (i32, i32) {
    %c0_i32 = arith.constant 0 : i32
    %c0_i32_0 = arith.constant 0 : i32
    %c0_i32_1 = arith.constant 0 : i32
    return %c0_i32, %c0_i32_0 : i32, i32
  }
}

module attributes {stable_mosaic.version = 11 : i64} {
  func.func @_style_proj_kernel(%arg0: i32, %arg1: i32, %arg2: memref<1x48x128xbf16, #tpu.memory_space<vmem>>, %arg3: memref<1x48x128xbf16, #tpu.memory_space<vmem>>, %arg4: memref<128x128xbf16, #tpu.memory_space<vmem>>, %arg5: memref<1x128xf32, #tpu.memory_space<vmem>>, %arg6: memref<128x128xbf16, #tpu.memory_space<vmem>>, %arg7: memref<1x128xf32, #tpu.memory_space<vmem>>, %arg8: memref<1x48x128xbf16, #tpu.memory_space<vmem>>, %arg9: memref<1x48x128xbf16, #tpu.memory_space<vmem>>) attributes {dimension_semantics = [#tpu.dimension_semantics<parallel>, #tpu.dimension_semantics<parallel>], iteration_bounds = array<i64: 2, 2>, scalar_prefetch = 0 : i64, scratch_operands = 0 : i64, tpu.core_type = #tpu.core_type<tc>, window_params = [{transform_indices = @transform_0, window_bounds = array<i64: 1, 48, 128>}, {transform_indices = @transform_1, window_bounds = array<i64: 1, 48, 128>}, {pipeline_mode = #tpu.pipeline_mode<synchronous>, transform_indices = @transform_2, window_bounds = array<i64: 128, 128>}, {pipeline_mode = #tpu.pipeline_mode<synchronous>, transform_indices = @transform_3, window_bounds = array<i64: 1, 128>}, {pipeline_mode = #tpu.pipeline_mode<synchronous>, transform_indices = @transform_4, window_bounds = array<i64: 128, 128>}, {pipeline_mode = #tpu.pipeline_mode<synchronous>, transform_indices = @transform_5, window_bounds = array<i64: 1, 128>}, {transform_indices = @transform_6, window_bounds = array<i64: 1, 48, 128>}, {transform_indices = @transform_7, window_bounds = array<i64: 1, 48, 128>}]} {
    %c0 = arith.constant 0 : index
    %c0_0 = arith.constant 0 : index
    %c0_1 = arith.constant 0 : index
    %0 = vector.load %arg2[%c0, %c0_0, %c0_1] : memref<1x48x128xbf16, #tpu.memory_space<vmem>>, vector<1x48x128xbf16>
    %1 = vector.shape_cast %0 : vector<1x48x128xbf16> to vector<48x128xbf16>
    %c0_2 = arith.constant 0 : index
    %c0_3 = arith.constant 0 : index
    %2 = vector.load %arg4[%c0_2, %c0_3] : memref<128x128xbf16, #tpu.memory_space<vmem>>, vector<128x128xbf16>
    %cst = arith.constant dense<0.000000e+00> : vector<48x128xf32>
    %3 = tpu.matmul %1, %2, %cst {dimension_numbers = #tpu.dot_dimension_numbers<[1], [0], [0], [1], [0, 0, 1, 1], [], []>} : vector<48x128xbf16>, vector<128x128xbf16>, vector<48x128xf32> -> vector<48x128xf32>
    %c0_4 = arith.constant 0 : index
    %c0_5 = arith.constant 0 : index
    %4 = vector.load %arg5[%c0_4, %c0_5] : memref<1x128xf32, #tpu.memory_space<vmem>>, vector<1x128xf32>
    %5 = vector.broadcast %4 : vector<1x128xf32> to vector<48x128xf32>
    %6 = arith.addf %3, %5 : vector<48x128xf32>
    %7 = arith.truncf %6 : vector<48x128xf32> to vector<48x128xbf16>
    %c0_6 = arith.constant 0 : index
    %c0_7 = arith.constant 0 : index
    %c0_8 = arith.constant 0 : index
    %8 = vector.load %arg8[%c0_6, %c0_7, %c0_8] : memref<1x48x128xbf16, #tpu.memory_space<vmem>>, vector<1x48x128xbf16>
    %9 = vector.shape_cast %8 : vector<1x48x128xbf16> to vector<48x128xbf16>
    %10 = vector.shape_cast %7 : vector<48x128xbf16> to vector<1x48x128xbf16>
    tpu.vector_store %arg8[%c0_6, %c0_7, %c0_8], %10 {strides = array<i32>} : memref<1x48x128xbf16, #tpu.memory_space<vmem>>, vector<1x48x128xbf16>,
    %c0_9 = arith.constant 0 : index
    %c0_10 = arith.constant 0 : index
    %c0_11 = arith.constant 0 : index
    %11 = vector.load %arg3[%c0_9, %c0_10, %c0_11] : memref<1x48x128xbf16, #tpu.memory_space<vmem>>, vector<1x48x128xbf16>
    %12 = vector.shape_cast %11 : vector<1x48x128xbf16> to vector<48x128xbf16>
    %c0_12 = arith.constant 0 : index
    %c0_13 = arith.constant 0 : index
    %13 = vector.load %arg6[%c0_12, %c0_13] : memref<128x128xbf16, #tpu.memory_space<vmem>>, vector<128x128xbf16>
    %cst_14 = arith.constant dense<0.000000e+00> : vector<48x128xf32>
    %14 = tpu.matmul %12, %13, %cst_14 {dimension_numbers = #tpu.dot_dimension_numbers<[1], [0], [0], [1], [0, 0, 1, 1], [], []>} : vector<48x128xbf16>, vector<128x128xbf16>, vector<48x128xf32> -> vector<48x128xf32>
    %c0_15 = arith.constant 0 : index
    %c0_16 = arith.constant 0 : index
    %15 = vector.load %arg7[%c0_15, %c0_16] : memref<1x128xf32, #tpu.memory_space<vmem>>, vector<1x128xf32>
    %16 = vector.broadcast %15 : vector<1x128xf32> to vector<48x128xf32>
    %17 = arith.addf %14, %16 : vector<48x128xf32>
    %18 = arith.truncf %17 : vector<48x128xf32> to vector<48x128xbf16>
    %c0_17 = arith.constant 0 : index
    %c0_18 = arith.constant 0 : index
    %c0_19 = arith.constant 0 : index
    %19 = vector.load %arg9[%c0_17, %c0_18, %c0_19] : memref<1x48x128xbf16, #tpu.memory_space<vmem>>, vector<1x48x128xbf16>
    %20 = vector.shape_cast %19 : vector<1x48x128xbf16> to vector<48x128xbf16>
    %21 = vector.shape_cast %18 : vector<48x128xbf16> to vector<1x48x128xbf16>
    tpu.vector_store %arg9[%c0_17, %c0_18, %c0_19], %21 {strides = array<i32>} : memref<1x48x128xbf16, #tpu.memory_space<vmem>>, vector<1x48x128xbf16>,
    return
  }
  func.func @transform_0(%arg0: i32, %arg1: i32) -> (i32, i32, i32) {
    %c0_i32 = arith.constant 0 : i32
    %c0_i32_0 = arith.constant 0 : i32
    return %arg0, %arg1, %c0_i32 : i32, i32, i32
  }
  func.func @transform_1(%arg0: i32, %arg1: i32) -> (i32, i32, i32) {
    %c0_i32 = arith.constant 0 : i32
    %c0_i32_0 = arith.constant 0 : i32
    return %arg0, %arg1, %c0_i32 : i32, i32, i32
  }
  func.func @transform_2(%arg0: i32, %arg1: i32) -> (i32, i32) {
    %c0_i32 = arith.constant 0 : i32
    %c0_i32_0 = arith.constant 0 : i32
    %c0_i32_1 = arith.constant 0 : i32
    return %c0_i32, %c0_i32_0 : i32, i32
  }
  func.func @transform_3(%arg0: i32, %arg1: i32) -> (i32, i32) {
    %c0_i32 = arith.constant 0 : i32
    %c0_i32_0 = arith.constant 0 : i32
    %c0_i32_1 = arith.constant 0 : i32
    return %c0_i32, %c0_i32_0 : i32, i32
  }
  func.func @transform_4(%arg0: i32, %arg1: i32) -> (i32, i32) {
    %c0_i32 = arith.constant 0 : i32
    %c0_i32_0 = arith.constant 0 : i32
    %c0_i32_1 = arith.constant 0 : i32
    return %c0_i32, %c0_i32_0 : i32, i32
  }
  func.func @transform_5(%arg0: i32, %arg1: i32) -> (i32, i32) {
    %c0_i32 = arith.constant 0 : i32
    %c0_i32_0 = arith.constant 0 : i32
    %c0_i32_1 = arith.constant 0 : i32
    return %c0_i32, %c0_i32_0 : i32, i32
  }
  func.func @transform_6(%arg0: i32, %arg1: i32) -> (i32, i32, i32) {
    %c0_i32 = arith.constant 0 : i32
    %c0_i32_0 = arith.constant 0 : i32
    return %arg0, %arg1, %c0_i32 : i32, i32, i32
  }
  func.func @transform_7(%arg0: i32, %arg1: i32) -> (i32, i32, i32) {
    %c0_i32 = arith.constant 0 : i32
    %c0_i32_0 = arith.constant 0 : i32
    return %arg0, %arg1, %c0_i32 : i32, i32, i32
  }
}

</mosaic_0001>

<bundles_post_ra>
// kernel: tpu_custom_call.1
= control target key start
LH: loop header
LB: loop body
LE: loop exit
PB: predicated region body
PF: predicated region fallthrough
CT: control target
= control target key end

     0   :  { %6 = vsyncpa [#allocation3], 0  ;;  %s124_s0 = inlined_call_operand.hbm [shape: f32[8,128], index: 0, kind: input, shape index: {}]   ;;  %s125_s1 = inlined_call_operand.hbm [shape: f32[8,128], index: 1, kind: output, shape index: {}]  }
   0x1   :  { %7 = vsyncpa [#allocation4], 0  ;;  %s88_s6 = smov [#allocation2]   ;;  %s40_s10 = scalar_lea.hbm %s124_s0, 128 }
   0x2   :  { %s14_s7 = sshll.u32 %s88_s6, 4  ;;  %p41_p0 = scmp.ne.s32.totalorder %s124_s0, %s40_s10  ;;  %s15_s7 = int_to_ptr.vmem [resolvable:$true] %s14_s7 }
   0x3   :  { %p44_p1 = scmp.lt.u32.totalorder %s40_s10, %s124_s0 }
   0x5   :  { %p46_p2 = pnand %p44_p1, %p41_p0 }
   0x7   :  { %49 = shalt.err (!%p46_p2)
}
   0x8   :  { %s50_s15 = scalar_lea.vmem %s15_s7, 128  ;;  %p55_p4 = scmp.lt.s32.totalorder %s15_s7, %s15_s7 }
   0x9   :  { %p51_p3 = scmp.ne.s32.totalorder %s15_s7, %s50_s15  ;;  %p56_p5 = scmp.lt.s32.totalorder %s50_s15, %s50_s15 }
   0xb   :  { %p57_p6 = por %p56_p5, %p55_p4 }
   0xd   :  { %p58_p7 = pnand %p57_p6, %p51_p3 }
   0xf   :  { %61 = shalt.err (!%p58_p7)
}
  0x10   :  { %17 = dma.hbm_to_vmem [thread:$0]  %s124_s0, 128, %s15_s7, [#allocation3]  }
  0x11   :  { %84 = dma.done.wait [#allocation3], 128  }
  0x12   :  { %85 = vsyncadd [#allocation3], 4294967168  ;;  %s89_s18 = smov [#allocation5]   ;;  %v21_v0 = vld [vmem:[#allocation2] sm:$0xff] }
  0x13   :  { %s29_s19 = sshll.u32 %s89_s18, 4  ;;  %22 = vst [vmem:[#allocation5] sm:$0xff] %v21_v0  ;;  %s30_s19 = int_to_ptr.vmem [resolvable:$true] %s29_s19 }
  0x14   :  { %s62_s20 = scalar_lea.vmem %s30_s19, 128  ;;  %p67_p9 = scmp.lt.s32.totalorder %s30_s19, %s30_s19 }
  0x15   :  { %p63_p8 = scmp.ne.s32.totalorder %s30_s19, %s62_s20  ;;  %p68_p10 = scmp.lt.s32.totalorder %s62_s20, %s62_s20 }
  0x17   :  { %p69_p11 = por %p68_p10, %p67_p9 }
  0x19   :  { %p70_p12 = pnand %p69_p11, %p63_p8 }
  0x1b   :  { %73 = shalt.err (!%p70_p12)
}
  0x1c   :  { %s74_s23 = scalar_lea.hbm %s125_s1, 128 }
  0x1d   :  { %p75_p13 = scmp.ne.s32.totalorder %s125_s1, %s74_s23  ;;  %p78_p0 = scmp.lt.u32.totalorder %s74_s23, %s125_s1 }
  0x1f   :  { %p80_p1 = pnand %p78_p0, %p75_p13 }
  0x21   :  { %83 = shalt.err (!%p80_p1)
}
  0x22   :  { %32 = dma.vmem_to_hbm [thread:$0]  %s30_s19, 128, %s125_s1, [#allocation4]  }
  0x23   :  { %86 = dma.done.wait [#allocation4], 128  }
  0x24   :  { %87 = vsyncadd [#allocation4], 4294967168 }
  0x25   :  { %36 = vsyncpa [#allocation3], 1 }
  0x26   :  { %37 = vsyncpa [#allocation4], 1 }

// kernel: tpu_custom_call.1
= control target key start
LH: loop header
LB: loop body
LE: loop exit
PB: predicated region body
PF: predicated region fallthrough
CT: control target
= control target key end

     0   :  { %s2038_s0 = inlined_call_operand.hbm [shape: bf16[2,96,128], index: 0, kind: input, shape index: {}]   ;;  %s2039_s1 = inlined_call_operand.hbm [shape: bf16[2,96,128], index: 1, kind: input, shape index: {}]   ;;  %s2040_s2 = inlined_call_operand.hbm [shape: bf16[128,128], index: 2, kind: input, shape index: {}]   ;;  %s2041_s3 = inlined_call_operand.vmem [shape: f32[1,128], index: 3, kind: input, shape index: {}]   ;;  %s2042_s4 = inlined_call_operand.hbm [shape: bf16[128,128], index: 4, kind: input, shape index: {}]   ;;  %s2043_s5 = inlined_call_operand.vmem [shape: f32[1,128], index: 5, kind: input, shape index: {}]   ;;  %s2044_s6 = inlined_call_operand.hbm [shape: bf16[2,96,128], index: 6, kind: output, shape index: {0}]   ;;  %s2045_s7 = inlined_call_operand.hbm [shape: bf16[2,96,128], index: 7, kind: output, shape index: {1}]  }
   0x1   :  { %2061 = sst [smem:[#allocation25_spill]] %s2038_s0 }
   0x2   :  { %2062 = sst [smem:[#allocation26_spill]] %s2040_s2 }
   0x3   :  { %2063 = sst [smem:[#allocation27_spill]] %s2042_s4 }
   0x4   :  { %2064 = sst [smem:[#allocation28_spill]] %s2044_s6 }
   0x5   :  { %2065 = sst [smem:[#allocation29_spill]] %s2045_s7 }
   0x6   :  { %13 = vsyncpa [#allocation3], 0 }
   0x7   :  { %15 = vsyncpa [#allocation3 + $0x1], 0 }
   0x8   :  { %16 = vsyncpa [#allocation6], 0 }
   0x9   :  { %18 = vsyncpa [#allocation6 + $0x1], 0 }
   0xa   :  { %19 = vsyncpa [#allocation9], 0 }
   0xb   :  { %20 = vsyncpa [#allocation4], 0 }
   0xc   :  { %22 = vsyncpa [#allocation4 + $0x1], 0 }
   0xd   :  { %23 = vsyncpa [#allocation12], 0 }
   0xe   :  { %25 = vsyncpa [#allocation12 + $0x1], 0  ;;  %s1610_s24 = smov 0   ;;  %s1612_s25 = smov 0  }
   0xf   :  { %s1614_s26 = smov 0   ;;  %s1616_s27 = smov 0  }
  0x10   :  { %s1618_s28 = smov 0   ;;  %s1620_s29 = smov 0  }
  0x11   :  { %s1622_s30 = smov 0   ;;  %s1624_s8 = smov 0  }
  0x12 LB: > { %2066 = sst [smem:[#allocation19_spill]] %s1528_s24  ;;  %s1651_s9 = sadd.s32 4294967295, %s1556_s8   ;;  %s1556_s8 = sphi %s1624_s8, %s31_s8   ;;  %s1552_s30 = sphi %s1622_s30, %s2099_s30   ;;  %s1548_s29 = sphi %s1620_s29, %s2098_s29   ;;  %s1544_s28 = sphi %s1618_s28, %s2097_s28   ;;  %s1540_s27 = sphi %s1616_s27, %s2096_s27   ;;  %s1536_s26 = sphi %s1614_s26, %s2102_s26   ;;  %s1532_s25 = sphi %s1612_s25, %s2101_s25   ;;  %s1528_s24 = sphi %s1610_s24, %s2100_s24  }
  0x13   : > { %2067 = sst [smem:[#allocation20_spill]] %s1548_s29  ;;  %s980_s10 = sadd.s32 4294967294, %s1556_s8  }
  0x14   : > { %2068 = sst [smem:[#allocation21_spill]] %s1552_s30  ;;  %p65_p0 = scmp.ne.s32.totalorder %s1532_s25, %s1528_s24 }
  0x15   : > { %p2046_p1 = scmp.eq.s32.totalorder %s1651_s9, 0  ;;  %p209_p3 = scmp.eq.s32.totalorder %s980_s10, 3 }
  0x16   : > { %p981_p5 = scmp.ge.s32.totalorder %s1556_s8, 1  ;;  %p244_p7 = scmp.lt.s32.totalorder %s1556_s8, 5 }
  0x17   : > { %p1660_p4 = por %p2046_p1, %p65_p0  ;;  %p1665_p6 = por %p209_p3, %p65_p0 }
  0x18   : > { %p1670_p8 = pnand %p981_p5, %p244_p7  ;;  %s1558_s14 = smov [#allocation7]  }
  0x19   : > { %s2069_s11 = scalar_select %p1660_p4, 1, 0 }
  0x1a   : > { %s2070_s12 = scalar_select %p1665_p6, 1, 0 }
  0x1b   : > { %s2072_s13 = scalar_select %p1670_p8, 1, 0 }
  0x1c   : > { %2071 = sst [smem:[#allocation22_spill]] %s2070_s12  ;;  %s256_s15 = sshll.u32 %s1558_s14, 4  ;;  %s257_s15 = int_to_ptr.vmem [resolvable:$true] %s256_s15 }
  0x1d   : > { %p1177_p9 = pneg %p1670_p8  ;;  %s1559_s17 = smov [#allocation8]  }
  0x1e   : > { %s272_s18 = sshll.u32 %s1559_s17, 4  ;;  %s2074_s2 = sld [smem:[#allocation26_spill]]  ;;  %s1682_s18 = int_to_ptr.vmem [resolvable:$true] %s272_s18 }
  0x1f   : > { %p1678_p10 = pnand %p1177_p9, %p2046_p1 }
  0x21   : > { %p1300_p12 = pneg %p1678_p10 }
  0x24   : > { %s1298_s21 = scalar_lea.hbm %s2074_s2, 1024 }
  0x25   : > { %p1299_p11 = scmp.ne.s32.totalorder %s2074_s2, %s1298_s21  ;;  %p1305_p3 = scmp.lt.u32.totalorder %s1298_s21, %s2074_s2 }
  0x27   : > { %p1301_p13 = pnand %p1300_p12, %p1299_p11 }
  0x29   : > { %p1302_p0 = pneg %p1301_p13 }
  0x2b   : > { %p1307_p5 = pnand %p1305_p3, %p1302_p0 }
  0x2d   : > { %1310 = shalt.err (!%p1307_p5)
}
  0x2e   : > { %s1311_s17 = scalar_lea.vmem %s257_s15, 1024  ;;  %p1319_p2 = scmp.lt.s32.totalorder %s257_s15, %s257_s15 }
  0x2f   : > { %p1312_p7 = scmp.ne.s32.totalorder %s257_s15, %s1311_s17  ;;  %p1320_p6 = scmp.lt.s32.totalorder %s1311_s17, %s1311_s17 }
  0x31   : > { %p1314_p9 = pnand %p1312_p7, %p1300_p12  ;;  %p1321_p4 = por %p1320_p6, %p1319_p2 }
  0x33   : > { %p1315_p1 = pneg %p1314_p9 }
  0x35   : > { %p1322_p8 = pnand %p1321_p4, %p1315_p1 }
  0x37   : > { %1325 = shalt.err (!%p1322_p8)
}
  0x38   : > { %s2052_s19 = smov 64   ;;  %s2054_s20 = smov 4  }
  0x39   : > { %1180 = dma.hbm_to_vmem [thread:$0]  (!%p1678_p10), %s2074_s2, 1024, %s257_s15, [#allocation6], %s2052_s19, %s2052_s19, %s2054_s20  }
  0x3a   : > { %s2075_s4 = sld [smem:[#allocation27_spill]] }
  0x40   : > { %s1326_s14 = scalar_lea.hbm %s2075_s4, 1024 }
  0x41   : > { %p1327_p1 = scmp.ne.s32.totalorder %s2075_s4, %s1326_s14  ;;  %p1333_p6 = scmp.lt.u32.totalorder %s1326_s14, %s2075_s4 }
  0x43   : > { %p1329_p2 = pnand %p1327_p1, %p1300_p12 }
  0x45   : > { %p1330_p4 = pneg %p1329_p2 }
  0x47   : > { %p1335_p8 = pnand %p1333_p6, %p1330_p4 }
  0x49   : > { %1338 = shalt.err (!%p1335_p8)
}
  0x4a   : > { %s1339_s15 = scalar_lea.vmem %s1682_s18, 1024  ;;  %p1347_p3 = scmp.lt.s32.totalorder %s1682_s18, %s1682_s18 }
  0x4b   : > { %p1340_p11 = scmp.ne.s32.totalorder %s1682_s18, %s1339_s15  ;;  %p1348_p5 = scmp.lt.s32.totalorder %s1339_s15, %s1339_s15 }
  0x4d   : > { %p1342_p13 = pnand %p1340_p11, %p1300_p12  ;;  %p1349_p7 = por %p1348_p5, %p1347_p3 }
  0x4f   : > { %p1343_p0 = pneg %p1342_p13 }
  0x51   : > { %p1350_p9 = pnand %p1349_p7, %p1343_p0 }
  0x53   : > { %1353 = shalt.err (!%p1350_p9)
}
  0x54   : > { %1183 = dma.hbm_to_vmem [thread:$0]  (!%p1678_p10), %s2075_s4, 1024, %s1682_s18, [#allocation9], %s2052_s19, %s2052_s19, %s2054_s20  }
  0x55   : > { %s40_s12 = sadd.s32 1, %s1548_s29  ;;  %s43_s16 = sadd.s32 1, %s1552_s30 }
  0x56   : > { %p41_p12 = scmp.ge.s32.totalorder %s40_s12, 2  ;;  %s52_s21 = sadd.s32 1, %s1536_s26 }
  0x57   : > { %p59_p1 = scmp.ne.s32.totalorder %s1536_s26, %s1532_s25  ;;  %p60_p2 = scmp.eq.s32.totalorder %s1556_s8, 0 }
  0x58   : > { %s2104_s12 = smov (%p41_p12, %s40_s12), 0  ;;  %s2106_s16 = smov (!%p41_p12, %s43_s16), %s1552_s30 }
  0x59   : > { %2076 = sst [smem:[#allocation23_spill]] %s2104_s12  ;;  %s48_s22 = ssub.s32 %s1548_s29, %s2104_s12 }
  0x5a   : > { %p1748_p4 = por %p60_p2, %p59_p1  ;;  %p45_p10 = scmp.ge.s32.totalorder %s2106_s16, 2 }
  0x5b   : > { %p2078_p6 = scmp.eq.s32.totalorder %s1651_s9, 3  ;;  %p1200_p11 = scmp.lt.s32.totalorder %s1556_s8, 4 }
  0x5c   : > { %s289_s10 = sand.u32 1, %s1536_s26   ;;  %s2108_s16 = smov (%p45_p10, %s2106_s16), 0 }
  0x5d   : > { %p1754_p8 = por %p2078_p6, %p59_p1  ;;  %2080 = sst [smem:[#allocation24_spill]] %s2108_s16 }
  0x5e   : > { %s1762_s14 = smul.u32 24, %s289_s10  ;;  %s47_s17 = ssub.s32 %s1552_s30, %s2108_s16 }
  0x5f   : > { %s294_s15 = smul.u32 6, %s1548_s29  ;;  %s49_s7 = sor.u32 %s48_s22, %s47_s17 }
  0x60   : > { %p50_p13 = scmp.eq.s32.totalorder %s49_s7, 0  ;;  %s1155_s24 = smul.u32 12, %s1552_s30 }
  0x61   : > { %s293_s19 = scalar_lea.vmem [#allocation2], %s1762_s14  ;;  %p1771_p0 = pnand %p1200_p11, %p1748_p4 }
  0x62   : > { %s302_s20 = sshll.u32 %s293_s19, 4  ;;  %s299_s12 = sadd.s32 %s1155_s24, %s294_s15  ;;  %s1778_s20 = int_to_ptr.vmem [resolvable:$true] %s302_s20 }
  0x63   : > { %s1776_s4 = scalar_select %p50_p13, %s1536_s26, %s52_s21  }
  0x64   : > { %s985_s6 = sshll.u32 %s299_s12, 6  ;;  %s2082_s0 = sld [smem:[#allocation25_spill]] }
  0x65   : > { %s1788_s23 = scalar_lea.hbm %s2039_s1, %s985_s6  ;;  %s1790_s21 = scalar_lea.sflag [#allocation3], %s289_s10 }
  0x66   : > { %p1356_p5 = pneg %p1771_p0 }
  0x6a   : > { %s1783_s22 = scalar_lea.hbm %s2082_s0, %s985_s6  ;;  %s1359_s16 = scalar_lea.hbm %s2082_s0, 1536 }
  0x6b   : > { %s1354_s15 = scalar_lea.hbm %s1783_s22, 384  ;;  %p1360_p12 = scmp.lt.u32.totalorder %s1783_s22, %s2082_s0 }
  0x6c   : > { %p1355_p3 = scmp.ne.s32.totalorder %s1783_s22, %s1354_s15  ;;  %p1361_p1 = scmp.lt.u32.totalorder %s1359_s16, %s1354_s15 }
  0x6d   : > { %p1363_p4 = scmp.lt.u32.totalorder %s1354_s15, %s1783_s22 }
  0x6e   : > { %p1357_p7 = pnand %p1356_p5, %p1355_p3  ;;  %p1362_p2 = por %p1361_p1, %p1360_p12 }
  0x70   : > { %p1358_p9 = pneg %p1357_p7  ;;  %p1364_p10 = por %p1363_p4, %p1362_p2 }
  0x72   : > { %p1365_p6 = pnand %p1364_p10, %p1358_p9 }
  0x74   : > { %1368 = shalt.err (!%p1365_p6)
}
  0x75   : > { %s1369_s6 = scalar_lea.vmem %s1778_s20, 384  ;;  %s1562_s10 = smov [#allocation2]  }
  0x76   : > { %p1370_p11 = scmp.ne.s32.totalorder %s1778_s20, %s1369_s6  ;;  %s1374_s17 = sshll.u32 %s1562_s10, 4  ;;  %s1375_s17 = int_to_ptr.vmem [resolvable:$false] %s1374_s17 }
  0x77   : > { %s1376_s19 = scalar_lea.vmem %s1375_s17, 768  ;;  %p1377_p7 = scmp.lt.s32.totalorder %s1778_s20, %s1375_s17 }
  0x78   : > { %p1372_p13 = pnand %p1370_p11, %p1356_p5  ;;  %p1378_p12 = scmp.lt.s32.totalorder %s1376_s19, %s1369_s6 }
  0x7a   : > { %p1373_p3 = pneg %p1372_p13  ;;  %p1379_p1 = por %p1378_p12, %p1377_p7 }
  0x7c   : > { %p1380_p2 = pnand %p1379_p1, %p1373_p3 }
  0x7e   : > { %1383 = shalt.err (!%p1380_p2)
}
  0x7f   : > { %s2083_s15 = smov 4   ;;  %s2084_s29 = smov 64  }
  0x80   : > { %1187 = dma.hbm_to_vmem [thread:$0]  (!%p1771_p0), %s1783_s22, 384, %s1778_s20, %s1790_s21, %s2084_s29, %s2084_s29, %s2083_s15  }
  0x81   : > { %s312_s12 = sand.u32 1, %s1556_s8   ;;  %s316_s16 = scalar_lea.vmem [#allocation5], %s1762_s14 }
  0x82   : > { %s325_s7 = sshll.u32 %s316_s16, 4  ;;  %s1825_s24 = scalar_lea.sflag [#allocation6], %s312_s12  ;;  %s1823_s7 = int_to_ptr.vmem [resolvable:$true] %s325_s7 }
  0x83   : > { %s1384_s6 = scalar_lea.hbm %s1788_s23, 384  ;;  %s1389_s19 = scalar_lea.hbm %s2039_s1, 1536 }
  0x84   : > { %p1385_p9 = scmp.ne.s32.totalorder %s1788_s23, %s1384_s6  ;;  %p1390_p6 = scmp.lt.u32.totalorder %s1788_s23, %s2039_s1 }
  0x85   : > { %p1391_p11 = scmp.lt.u32.totalorder %s1389_s19, %s1384_s6  ;;  %p1393_p3 = scmp.lt.u32.totalorder %s1384_s6, %s1788_s23 }
  0x86   : > { %p1387_p4 = pnand %p1385_p9, %p1356_p5 }
  0x87   : > { %p1392_p13 = por %p1391_p11, %p1390_p6 }
  0x88   : > { %p1388_p10 = pneg %p1387_p4 }
  0x89   : > { %p1394_p7 = por %p1393_p3, %p1392_p13 }
  0x8b   : > { %p1395_p12 = pnand %p1394_p7, %p1388_p10 }
  0x8d   : > { %1398 = shalt.err (!%p1395_p12)
}
  0x8e   : > { %s1399_s20 = scalar_lea.vmem %s1823_s7, 384  ;;  %s1563_s14 = smov [#allocation5]  }
  0x8f   : > { %p1400_p1 = scmp.ne.s32.totalorder %s1823_s7, %s1399_s20  ;;  %s1404_s22 = sshll.u32 %s1563_s14, 4  ;;  %s1405_s22 = int_to_ptr.vmem [resolvable:$false] %s1404_s22 }
  0x90   : > { %s1406_s0 = scalar_lea.vmem %s1405_s22, 768  ;;  %p1407_p4 = scmp.lt.s32.totalorder %s1823_s7, %s1405_s22 }
  0x91   : > { %p1402_p2 = pnand %p1400_p1, %p1356_p5  ;;  %p1408_p6 = scmp.lt.s32.totalorder %s1406_s0, %s1399_s20 }
  0x93   : > { %p1403_p9 = pneg %p1402_p2  ;;  %p1409_p11 = por %p1408_p6, %p1407_p4 }
  0x95   : > { %p1410_p13 = pnand %p1409_p11, %p1403_p9 }
  0x97   : > { %1413 = shalt.err (!%p1410_p13)
}
  0x98   : > { %1190 = dma.hbm_to_vmem [thread:$0]  (!%p1771_p0), %s1788_s23, 384, %s1823_s7, %s1825_s24, %s2084_s29, %s2084_s29, %s2083_s15  }
  0x99   : > { %p2085_p5 = scmp.ne.s32.totalorder %s2072_s13, 0 }
  0x9a   : > { %s1857_s30 = sand.u32 (!%p2085_p5), 1, %s1532_s25   ;;  %p2086_p10 = scmp.ne.s32.totalorder (!%p2085_p5), %s2069_s11, 0 }
  0x9b   : > { %337 = sbr.rel (%p2085_p5) target bundleno = 478 (0x1de), region = 44  ;;  %s340_s2 = scalar_lea.sflag (!%p2085_p5), [#allocation3], %s1857_s30 }
  0x9c   : > { %s1860_s21 = smul.u32 (!%p2085_p5), 24, %s1857_s30 }
  0x9e   : > { %s1864_s12 = scalar_lea.vmem (!%p2085_p5), [#allocation2], %s1860_s21 }
  0xa2   : > { %1503 = dma.done.wait (%p2086_p10), %s340_s2, 384  }
  0xa3   : > { %1505 = vsyncadd (%p2086_p10), %s340_s2, 4294966912  ;;  %s348_s13 = sand.u32 1, %s1651_s9   ;;  %s1872_s15 = scalar_lea.vmem [#allocation5], %s1860_s21 }
  0xa4   : > { %s349_s23 = scalar_lea.sflag [#allocation6], %s348_s13 }
  0xa5   : > { %1507 = dma.done.wait (%p2086_p10), %s349_s23, 384  }
  0xa6   : > { %1509 = vsyncadd (%p2086_p10), %s349_s23, 4294966912  ;;  %p2087_p0 = scmp.eq.s32.totalorder %s1651_s9, 0 }
  0xa8   : > { %1511 = dma.done.wait (%p2087_p0), [#allocation6], 1024   ;;  %p2088_p3 = pmov %p2087_p0 }
  0xa9   : > { %p2089_p7 = pmov %p2087_p0 }
  0xaa   : > { %1513 = vsyncadd (%p2088_p3), [#allocation6], 4294966272 }
  0xab   : > { %1515 = dma.done.wait (%p2089_p7), [#allocation9], 1024   ;;  %p2090_p12 = pmov %p2087_p0 }
  0xac   : > { %v1564_v0 = vmov 0.0   ;;  %vm1565_vm0 = vmmov 0   ;;  %v1276_v1 = vld [vmem:[#allocation7] sm:$0xff]   ;;  %v1278_v3 = vld [vmem:[#allocation7 + $0x8] sm:$0xff]   ;;  %v1280_v5 = vld [vmem:[#allocation7 + $0x10] sm:$0xff]   ;;  %s1927_s7 = scalar_lea.vmem [#allocation10], %s1860_s21 }
  0xad   : > { %1517 = vsyncadd (%p2090_p12), [#allocation9], 4294966272  ;;  %1098 = vmatprep.subr.bf16.mxu0 %v1564_v0  ;;  %1126 = vmatprep.subr.bf16.mxu1 %v1564_v0  ;;  %v1277_v2 = vld [vmem:[#allocation8] sm:$0xff]   ;;  %v1279_v4 = vld [vmem:[#allocation8 + $0x8] sm:$0xff]   ;;  %s1931_s24 = scalar_lea.vmem [#allocation11], %s1860_s21  ;;  %s783_s6 = smul.u32 6, %s1540_s27 }
  0xae   : > { %1114 = vmatprep.mubr.msk.bf16.mxu0 %vm1565_vm0, %v1564_v0  ;;  %1142 = vmatprep.mubr.msk.bf16.mxu1 %vm1565_vm0, %v1564_v0  ;;  %v1281_v6 = vld [vmem:[#allocation8 + $0x10] sm:$0xff]   ;;  %v1282_v7 = vld [vmem:[#allocation7 + $0x18] sm:$0xff]   ;;  %v1284_v9 = vld [vmem:[#allocation7 + $0x20] sm:$0xff]   ;;  %s1159_s10 = smul.u32 12, %s1544_s28  ;;  %s791_s19 = sshll.u32 %s1927_s7, 4  ;;  %s1940_s19 = int_to_ptr.vmem [resolvable:$true] %s791_s19 }
  0xaf   : > { %1099 = vmatpush3.bf16.msra.mxu0 %v1276_v1  ;;  %1127 = vmatpush3.bf16.msra.mxu1 %v1277_v2  ;;  %v1283_v8 = vld [vmem:[#allocation8 + $0x18] sm:$0xff]   ;;  %v1285_v10 = vld [vmem:[#allocation8 + $0x20] sm:$0xff]   ;;  %v1286_v11 = vld [vmem:[#allocation7 + $0x28] sm:$0xff]   ;;  %s809_s20 = sshll.u32 %s1931_s24, 4  ;;  %s2091_s22 = sld [smem:[#allocation28_spill]]  ;;  %s1942_s20 = int_to_ptr.vmem [resolvable:$true] %s809_s20 }
  0xb0   : > { %1100 = vmatprep.subr.bf16.mxu0 %v1564_v0  ;;  %1128 = vmatprep.subr.bf16.mxu1 %v1564_v0  ;;  %v1287_v12 = vld [vmem:[#allocation8 + $0x28] sm:$0xff]   ;;  %v1288_v13 = vld [vmem:[#allocation7 + $0x30] sm:$0xff]   ;;  %v1290_v15 = vld [vmem:[#allocation7 + $0x38] sm:$0xff]   ;;  %s788_s17 = sadd.s32 %s1159_s10, %s783_s6  ;;  %s771_s23 = scalar_lea.sflag [#allocation4], %s1857_s30 }
  0xb1   : > { %v1289_v14 = vld [vmem:[#allocation8 + $0x30] sm:$0xff]   ;;  %v1291_v16 = vld [vmem:[#allocation8 + $0x38] sm:$0xff]   ;;  %v1294_v19 = vld [vmem:[%s1864_s12 + $0x8] sm:$0xff]   ;;  %s1026_s27 = sshll.u32 %s788_s17, 6  ;;  %s1566_s9 = smov [#allocation10]  }
  0xb2   : > { %v1292_v17 = vld [vmem:[%s1864_s12] sm:$0xff]   ;;  %v1293_v18 = vld [vmem:[%s1872_s15] sm:$0xff]   ;;  %v1295_v20 = vld [vmem:[%s1872_s15 + $0x8] sm:$0xff]   ;;  %s1418_s11 = sshll.u32 %s1566_s9, 4  ;;  %s1419_s11 = int_to_ptr.vmem [resolvable:$false] %s1418_s11 }
  0xb3   : > { %1101 = vmatpush3.bf16.msra.mxu0 %v1278_v3  ;;  %1129 = vmatpush3.bf16.msra.mxu1 %v1279_v4  ;;  %v1296_v21 = vld [vmem:[%s1864_s12 + $0x10] sm:$0xff]   ;;  %v1297_v22 = vld [vmem:[%s1872_s15 + $0x10] sm:$0xff]   ;;  %s2092_s12 = sld [smem:[#allocation29_spill]]  ;;  %s1414_s15 = scalar_lea.vmem %s1940_s19, 384 }
  0xb4   : > { %1102 = vmatprep.subr.bf16.mxu0 %v1564_v0  ;;  %1130 = vmatprep.subr.bf16.mxu1 %v1564_v0  ;;  %v990_v23 = vld [vmem:[%s2041_s3] ss:$0 sm:$0xff]  ;;  %p1415_p1 = scmp.ne.s32.totalorder %s1940_s19, %s1414_s15  ;;  %s1420_s29 = scalar_lea.vmem %s1419_s11, 768 }
  0xb5   : > { %v1008_v25 = vld [vmem:[%s2043_s5] ss:$0 sm:$0xff]  ;;  %s1947_s0 = scalar_lea.hbm %s2091_s22, %s1026_s27  ;;  %p1421_p4 = scmp.lt.s32.totalorder %s1940_s19, %s1419_s11 }
  0xb6   : > { %p1416_p2 = pnand %p1415_p1, %p1754_p8  ;;  %p1422_p6 = scmp.lt.s32.totalorder %s1420_s29, %s1414_s15 }
  0xb7   : > { %1103 = vmatpush3.bf16.msra.mxu0 %v1280_v5  ;;  %1131 = vmatpush3.bf16.msra.mxu1 %v1281_v6 }
  0xb8   : > { %1104 = vmatprep.subr.bf16.mxu0 %v1564_v0  ;;  %1132 = vmatprep.subr.bf16.mxu1 %v1564_v0  ;;  %p1417_p9 = pneg %p1416_p2  ;;  %p1423_p11 = por %p1422_p6, %p1421_p4 }
  0xb9   : > { %s1952_s13 = scalar_lea.hbm %s2092_s12, %s1026_s27 }
  0xba   : > { %p1424_p13 = pnand %p1423_p11, %p1417_p9 }
  0xbb   : > { %1105 = vmatpush3.bf16.msra.mxu0 %v1282_v7  ;;  %1133 = vmatpush3.bf16.msra.mxu1 %v1283_v8 }
  0xbc   : > { %1106 = vmatprep.subr.bf16.mxu0 %v1564_v0  ;;  %1134 = vmatprep.subr.bf16.mxu1 %v1564_v0 }
  0xbf   : > { %1107 = vmatpush3.bf16.msra.mxu0 %v1284_v9  ;;  %1135 = vmatpush3.bf16.msra.mxu1 %v1285_v10 }
  0xc0   : > { %1108 = vmatprep.subr.bf16.mxu0 %v1564_v0  ;;  %1136 = vmatprep.subr.bf16.mxu1 %v1564_v0 }
  0xc3   : > { %1109 = vmatpush3.bf16.msra.mxu0 %v1286_v11  ;;  %1137 = vmatpush3.bf16.msra.mxu1 %v1287_v12 }
  0xc4   : > { %1110 = vmatprep.subr.bf16.mxu0 %v1564_v0  ;;  %1138 = vmatprep.subr.bf16.mxu1 %v1564_v0 }
  0xc7   : > { %1111 = vmatpush3.bf16.msra.mxu0 %v1288_v13  ;;  %1139 = vmatpush3.bf16.msra.mxu1 %v1289_v14 }
  0xc8   : > { %1112 = vmatprep.subr.bf16.mxu0 %v1564_v0  ;;  %1140 = vmatprep.subr.bf16.mxu1 %v1564_v0 }
  0xcb   : > { %1113 = vmatpush3.bf16.msra.mxu0 %v1290_v15  ;;  %1141 = vmatpush3.bf16.msra.mxu1 %v1291_v16 }
  0xce   : > { %1115 = vmatmul.mubr.bf16.vlgmr.msra.gmra.mrb[0].mxu0 %v1292_v17  ;;  %1143 = vmatmul.mubr.bf16.vlgmr.msra.gmra.mrb[0].mxu1 %v1293_v18 }
  0xcf   : > { %1118 = vmatprep.mubr.msk.bf16.mxu0 %vm1565_vm0, %v1564_v0  ;;  %1146 = vmatprep.mubr.msk.bf16.mxu1 %vm1565_vm0, %v1564_v0 }
  0xd6   : > { %1119 = vmatmul.mubr.bf16.gmra.mrb[4].mxu0 %v1294_v19  ;;  %1147 = vmatmul.mubr.bf16.gmra.mrb[4].mxu1 %v1295_v20 }
  0xd7   : > { %1122 = vmatprep.mubr.msk.bf16.mxu0 %vm1565_vm0, %v1564_v0  ;;  %1150 = vmatprep.mubr.msk.bf16.mxu1 %vm1565_vm0, %v1564_v0 }
  0xde   : > { %1123 = vmatmul.mubr.bf16.gmra.mrb[8].mxu0 %v1296_v21  ;;  %1151 = vmatmul.mubr.bf16.gmra.mrb[8].mxu1 %v1297_v22 }
 0x1a1   : > { %v535_v24 = vpop.f32.mrb[0].mxu0  ;;  %v717_v26 = vpop.f32.mrb[0].mxu1 }
 0x1a2   : > { %v1116_v27 = vpop.f32.mrb[1].mxu0  ;;  %v1144_v28 = vpop.f32.mrb[1].mxu1  ;;  %v536_v30 = vadd.f32 %v990_v23, %v535_v24  ;;  %v718_v34 = vadd.f32 %v1008_v25, %v717_v26 }
 0x1a3   : > { %v538_v29 = vpop.f32.mrb[2].mxu0  ;;  %v720_v32 = vpop.f32.mrb[2].mxu1 }
 0x1a4   : > { %v539_v31 = vadd.f32 %v990_v23, %v538_v29  ;;  %v1117_v33 = vpop.f32.mrb[3].mxu0  ;;  %v721_v35 = vadd.f32 %v1008_v25, %v720_v32  ;;  %v1145_v36 = vpop.f32.mrb[3].mxu1 }
 0x1a6   : > { %v1045_v37 = vpack.c.bf16 %v539_v31, %v536_v30  ;;  %v1060_v38 = vpack.c.bf16 %v721_v35, %v718_v34 }
 0x1a8   : > { %1046 = vst [vmem:[%s1927_s7] sm:$0xff] %v1045_v37   ;;  %1061 = vst [vmem:[%s1931_s24] sm:$0xff] %v1060_v38  }
 0x1a9   : > { %v543_v39 = vpop.f32.mrb[4].mxu0  ;;  %v725_v40 = vpop.f32.mrb[4].mxu1 }
 0x1aa   : > { %v1120_v41 = vpop.f32.mrb[5].mxu0  ;;  %v1148_v42 = vpop.f32.mrb[5].mxu1  ;;  %v544_v44 = vadd.f32 %v990_v23, %v543_v39  ;;  %v726_v48 = vadd.f32 %v1008_v25, %v725_v40 }
 0x1ab   : > { %v546_v43 = vpop.f32.mrb[6].mxu0  ;;  %v728_v46 = vpop.f32.mrb[6].mxu1 }
 0x1ac   : > { %v547_v45 = vadd.f32 %v990_v23, %v546_v43  ;;  %v1121_v47 = vpop.f32.mrb[7].mxu0  ;;  %v729_v49 = vadd.f32 %v1008_v25, %v728_v46  ;;  %v1149_v50 = vpop.f32.mrb[7].mxu1 }
 0x1ae   : > { %v1050_v51 = vpack.c.bf16 %v547_v45, %v544_v44  ;;  %v1065_v52 = vpack.c.bf16 %v729_v49, %v726_v48 }
 0x1b0   : > { %1072 = vst [vmem:[%s1927_s7 + $0x8] sm:$0xff] %v1050_v51   ;;  %1074 = vst [vmem:[%s1931_s24 + $0x8] sm:$0xff] %v1065_v52  }
 0x1b1   : > { %v551_v53 = vpop.f32.mrb[8].mxu0  ;;  %v733_v54 = vpop.f32.mrb[8].mxu1 }
 0x1b2   : > { %v1124_v55 = vpop.f32.mrb[9].mxu0  ;;  %v1152_v56 = vpop.f32.mrb[9].mxu1  ;;  %v552_v58 = vadd.f32 %v990_v23, %v551_v53  ;;  %v734_v62 = vadd.f32 %v1008_v25, %v733_v54 }
 0x1b3   : > { %v554_v57 = vpop.f32.mrb[10].mxu0  ;;  %v736_v60 = vpop.f32.mrb[10].mxu1 }
 0x1b4   : > { %v555_v59 = vadd.f32 %v990_v23, %v554_v57  ;;  %v1125_v61 = vpop.f32.mrb[11].mxu0  ;;  %v737_v63 = vadd.f32 %v1008_v25, %v736_v60  ;;  %v1153_v0 = vpop.f32.mrb[11].mxu1 }
 0x1b6   : > { %v1055_v1 = vpack.c.bf16 %v555_v59, %v552_v58  ;;  %v1070_v2 = vpack.c.bf16 %v737_v63, %v734_v62 }
 0x1b8   : > { %1073 = vst [vmem:[%s1927_s7 + $0x10] sm:$0xff] %v1055_v1   ;;  %1075 = vst [vmem:[%s1931_s24 + $0x10] sm:$0xff] %v1070_v2  }
 0x1b9   : > { %1427 = shalt.err (!%p1424_p13)
}
 0x1ba   : > { %s1428_s16 = scalar_lea.hbm %s1947_s0, 384  ;;  %s1432_s6 = scalar_lea.hbm %s2091_s22, 1536 }
 0x1bb   : > { %p1429_p5 = scmp.ne.s32.totalorder %s1947_s0, %s1428_s16  ;;  %p1433_p3 = scmp.lt.u32.totalorder %s1947_s0, %s2091_s22 }
 0x1bc   : > { %p1434_p7 = scmp.lt.u32.totalorder %s1432_s6, %s1428_s16  ;;  %p1436_p1 = scmp.lt.u32.totalorder %s1428_s16, %s1947_s0 }
 0x1bd   : > { %p1430_p10 = pnand %p1429_p5, %p1754_p8 }
 0x1be   : > { %p1435_p12 = por %p1434_p7, %p1433_p3 }
 0x1bf   : > { %p1431_p0 = pneg %p1430_p10 }
 0x1c0   : > { %p1437_p2 = por %p1436_p1, %p1435_p12 }
 0x1c2   : > { %p1438_p9 = pnand %p1437_p2, %p1431_p0 }
 0x1c4   : > { %1441 = shalt.err (!%p1438_p9)
}
 0x1c5   : > { %s1567_s27 = smov 64   ;;  %s1568_s28 = smov 4  }
 0x1c6   : > { %1173 = dma.vmem_to_hbm [thread:$0]  (%p1754_p8), %s1940_s19, 384, %s1947_s0, %s771_s23, %s1567_s27, %s1567_s27, %s1568_s28  }
 0x1c7   : > { %s776_s14 = scalar_lea.sflag [#allocation12], %s1857_s30  ;;  %s1442_s21 = scalar_lea.vmem %s1942_s20, 384 }
 0x1c8   : > { %p1443_p4 = scmp.ne.s32.totalorder %s1942_s20, %s1442_s21  ;;  %s1569_s2 = smov [#allocation11]  }
 0x1c9   : > { %s1446_s15 = sshll.u32 %s1569_s2, 4  ;;  %s1447_s15 = int_to_ptr.vmem [resolvable:$false] %s1446_s15 }
 0x1ca   : > { %p1444_p6 = pnand %p1443_p4, %p1754_p8  ;;  %s1448_s9 = scalar_lea.vmem %s1447_s15, 768 }
 0x1cb   : > { %p1449_p13 = scmp.lt.s32.totalorder %s1942_s20, %s1447_s15  ;;  %p1450_p5 = scmp.lt.s32.totalorder %s1448_s9, %s1442_s21 }
 0x1cc   : > { %p1445_p11 = pneg %p1444_p6 }
 0x1cd   : > { %p1451_p10 = por %p1450_p5, %p1449_p13 }
 0x1cf   : > { %p1452_p0 = pnand %p1451_p10, %p1445_p11 }
 0x1d1   : > { %1455 = shalt.err (!%p1452_p0)
}
 0x1d2   : > { %s1456_s19 = scalar_lea.hbm %s1952_s13, 384  ;;  %s1460_s11 = scalar_lea.hbm %s2092_s12, 1536 }
 0x1d3   : > { %p1457_p3 = scmp.ne.s32.totalorder %s1952_s13, %s1456_s19  ;;  %p1461_p1 = scmp.lt.u32.totalorder %s1952_s13, %s2092_s12 }
 0x1d4   : > { %p1462_p2 = scmp.lt.u32.totalorder %s1460_s11, %s1456_s19  ;;  %p1464_p4 = scmp.lt.u32.totalorder %s1456_s19, %s1952_s13 }
 0x1d5   : > { %p1458_p7 = pnand %p1457_p3, %p1754_p8 }
 0x1d6   : > { %p1463_p9 = por %p1462_p2, %p1461_p1 }
 0x1d7   : > { %p1459_p12 = pneg %p1458_p7 }
 0x1d8   : > { %p1465_p6 = por %p1464_p4, %p1463_p9 }
 0x1da   : > { %p1466_p11 = pnand %p1465_p6, %p1459_p12 }
 0x1dc   : > { %1469 = shalt.err (!%p1466_p11)
}
 0x1dd   : > { %1174 = dma.vmem_to_hbm [thread:$0]  (%p1754_p8), %s1942_s20, 384, %s1952_s13, %s776_s14, %s1567_s27, %s1567_s27, %s1568_s28  }
 0x1de PF: > { %s2093_s7 = sld [smem:[#allocation19_spill]]  ;;  %s2094_s24 = sld [smem:[#allocation22_spill]] }
 0x1df   : > { %p1203_p13 = scmp.ge.s32.totalorder %s1556_s8, 2 }
 0x1e4   : > { %s824_s6 = sand.u32 1, %s2093_s7   ;;  %p2095_p5 = scmp.ne.s32.totalorder %s2094_s24, 0 }
 0x1e5   : > { %s825_s10 = scalar_lea.sflag [#allocation4], %s824_s6 }
 0x1e6   : > { %p1192_p10 = pnand %p1203_p13, %p2095_p5 }
 0x1e8   : > { %1519 = dma.done.wait (!%p1192_p10), %s825_s10, 384  }
 0x1e9   : > { %1521 = vsyncadd (!%p1192_p10), %s825_s10, 4294966912  ;;  %s834_s18 = scalar_lea.sflag [#allocation12], %s824_s6 }
 0x1ea   : > { %1523 = dma.done.wait (!%p1192_p10), %s834_s18, 384  }
 0x1eb   : > { %1525 = vsyncadd (!%p1192_p10), %s834_s18, 4294966912  ;;  %s31_s8 = sadd.s32 1, %s1556_s8   ;;  %s2096_s27 = sld [smem:[#allocation20_spill]] }
 0x1ec   : > { %p28_p0 = scmp.ge.s32.totalorder %s31_s8, 6   ;;  %s2097_s28 = sld [smem:[#allocation21_spill]] }
 0x1ed   : > { %s2098_s29 = sld [smem:[#allocation23_spill]]  ;;  %s2099_s30 = sld [smem:[#allocation24_spill]] }
 0x1ee   : > { %s2100_s24 = smov %s1532_s25  ;;  %s2101_s25 = smov %s1536_s26 }
 0x1ef   : > { %s2102_s26 = smov %s1776_s4  ;;  %30 = sbr.rel (!%p28_p0) target bundleno = 18 (0x12), region = 127 }
 0x1f6   :  { %839 = vsyncpa [#allocation3], 1 }
 0x1f7   :  { %841 = vsyncpa [#allocation3 + $0x1], 1 }
 0x1f8   :  { %842 = vsyncpa [#allocation6], 1 }
 0x1f9   :  { %844 = vsyncpa [#allocation6 + $0x1], 1 }
 0x1fa   :  { %845 = vsyncpa [#allocation9], 1 }
 0x1fb   :  { %846 = vsyncpa [#allocation4], 1 }
 0x1fc   :  { %848 = vsyncpa [#allocation4 + $0x1], 1 }
 0x1fd   :  { %849 = vsyncpa [#allocation12], 1 }
 0x1fe   :  { %851 = vsyncpa [#allocation12 + $0x1], 1 }

</bundles_post_ra>
